<compile_context>
chip_gen: v7x
topology: tpu7x:2x2x1
jax: 0.10.0
libtpu: 0.0.40
codegen_flags: <defaults>
</compile_context>

<pallas_src>
import functools
import math

import jax
import jax.numpy as jnp
from jax.experimental import pallas as pl
from jax.experimental.pallas import tpu as pltpu

SMOOTH = 1e-5
DICE_W = 0.7
CE_W = 0.3

LANES = 128
_MAX_TILE_ROWS = 4096   # 4096 * 128 * 4 B = 2 MiB per f32 input block


def _edice_partial_kernel(x_ref, t_ref, out_ref, *, spatial, tile_rows, has_pad):
    """Per-(channel, batch, spatial-tile) partial sums.

    x_ref, t_ref : (tile_rows, 128) logits / targets (any dtype, cast to f32)
    out_ref      : (1, 1, 1, 8, 128) per-lane partial sums:
                     row 0 = sum(sigmoid(x) * t)
                     row 1 = sum(sigmoid(x)^2)
                     row 2 = sum(t^2)
                     row 3 = sum(BCE(sigmoid(x), t))   (rows 4..7 zero)
    """
    x = x_ref[...].astype(jnp.float32)
    t = t_ref[...].astype(jnp.float32)

    s = jax.nn.sigmoid(x)

    # log(1 - sigmoid(x)) == log(sigmoid(x)) - x  → one transcendental saved.
    # torch.nn.BCELoss clamps each log term at -100; keep the clamps.
    log_s_raw = jnp.log(s)
    log_s = jnp.maximum(log_s_raw, -100.0)
    log_1ms = jnp.maximum(log_s_raw - x, -100.0)
    bce = -(t * log_s + (1.0 - t) * log_1ms)

    s2 = s * s
    if has_pad:
        # Mask contributions from the zero-padded tail of a flattened (n, c)
        # slice.  Targets are zero-padded, so inter / t^2 need no mask.
        tile_idx = pl.program_id(2)
        row = jax.lax.broadcasted_iota(jnp.int32, (tile_rows, LANES), 0)
        lane = jax.lax.broadcasted_iota(jnp.int32, (tile_rows, LANES), 1)
        flat = (tile_idx * tile_rows + row) * LANES + lane
        mask = (flat < spatial).astype(jnp.float32)
        s2 = s2 * mask
        bce = bce * mask

    # Reduce over the sublane (row) axis only; the final 128-lane collapse is
    # deferred to the tiny JAX combine outside the kernel.
    inter_l = jnp.sum(s * t, axis=0)      # (128,)
    s2_l = jnp.sum(s2, axis=0)            # (128,)
    t2_l = jnp.sum(t * t, axis=0)         # (128,)
    bce_l = jnp.sum(bce, axis=0)          # (128,)

    row_id = jax.lax.broadcasted_iota(jnp.int32, (8, LANES), 0)
    packed = (jnp.where(row_id == 0, inter_l, 0.0)
              + jnp.where(row_id == 1, s2_l, 0.0)
              + jnp.where(row_id == 2, t2_l, 0.0)
              + jnp.where(row_id == 3, bce_l, 0.0))
    out_ref[...] = packed[None, None, None, :, :]


def edice_loss(inputs, target):
    """Pallas implementation of EDiceLoss.forward (do_sigmoid=True).

    inputs : (N, C, *spatial) logits (any float dtype)
    target : (N, C, *spatial) masks (any float/int dtype; 0/1 expected)
    """
    assert inputs.shape == target.shape
    N, C = inputs.shape[:2]
    spatial = math.prod(inputs.shape[2:])     # per-(n, c) element count

    # Lane-dense, transpose-free layout: (N, C, spatial) -> (N, C, rows, 128).
    rows = -(-spatial // LANES)
    if rows <= _MAX_TILE_ROWS:
        tile_rows = rows                       # block == full dim: no 8-quantum pad
        num_tiles = 1
    else:
        tile_rows = _MAX_TILE_ROWS
        num_tiles = -(-rows // tile_rows)
    rows_pad = tile_rows * num_tiles
    l_pad = rows_pad * LANES
    has_pad = (l_pad != spatial)

    def to_lane_dense(a):
        a = a.reshape(N, C, spatial)
        if has_pad:
            a = jnp.pad(a, ((0, 0), (0, 0), (0, l_pad - spatial)))
        return a.reshape(N, C, rows_pad, LANES)

    x_ld = to_lane_dense(inputs)
    t_ld = to_lane_dense(target)

    kernel = functools.partial(
        _edice_partial_kernel,
        spatial=spatial, tile_rows=tile_rows, has_pad=has_pad)

    partials = pl.pallas_call(
        kernel,
        out_shape=jax.ShapeDtypeStruct((C, N, num_tiles, 8, LANES), jnp.float32),
        grid_spec=pltpu.PrefetchScalarGridSpec(
            num_scalar_prefetch=0,
            grid=(C, N, num_tiles),            # innermost axis = contiguous HBM
            in_specs=[
                pl.BlockSpec((None, None, tile_rows, LANES),
                             lambda c, n, l: (n, c, l, 0)),
                pl.BlockSpec((None, None, tile_rows, LANES),
                             lambda c, n, l: (n, c, l, 0)),
            ],
            out_specs=pl.BlockSpec((1, 1, 1, 8, LANES),
                                   lambda c, n, l: (c, n, l, 0, 0)),
        ),
        compiler_params=pltpu.CompilerParams(
            dimension_semantics=("parallel", "parallel", "parallel"),
            vmem_limit_bytes=32 * 1024 * 1024,
        ),
    )(x_ld, t_ld)

    # Tiny scalar combine in plain JAX (per-channel dice / CE, weighted sum).
    sums = jnp.sum(partials[:, :, :, :4, :], axis=(1, 2, 4))   # (C, 4)
    inter, s2, tsq, bce_sum = sums[:, 0], sums[:, 1], sums[:, 2], sums[:, 3]
    n_valid = N * spatial                                       # per-channel count
    dice = (2.0 * inter + SMOOTH) / (s2 + tsq + SMOOTH)
    ce = bce_sum / jnp.float32(n_valid)
    return (DICE_W * jnp.sum(1.0 - dice) + CE_W * jnp.sum(ce)) / C


def edice_loss_ref(inputs, target):
    """Pure-JAX reference mirroring the PyTorch forward exactly."""
    C = target.shape[1]
    dice = 0.0
    ce = 0.0
    for i in range(C):
        x = inputs[:, i].astype(jnp.float32)
        t = target[:, i].astype(jnp.float32)
        s = jax.nn.sigmoid(x)
        inter = jnp.sum(s * t)
        d = (2.0 * inter + SMOOTH) / (jnp.sum(s * s) + jnp.sum(t * t) + SMOOTH)
        dice = dice + (1.0 - d)
        log_s = jnp.maximum(jnp.log(s), -100.0)
        log_1ms = jnp.maximum(jnp.log(1.0 - s), -100.0)
        ce = ce + jnp.mean(-(t * log_s + (1.0 - t) * log_1ms))
    return (DICE_W * dice + CE_W * ce) / C


if __name__ == "__main__":
    key = jax.random.PRNGKey(0)
    k1, k2 = jax.random.split(key)

    # BraTS-style: 3 label channels (ET, TC, WT), small spatial extent.
    N, C, H, W = 2, 3, 16, 16
    inputs = jax.random.normal(k1, (N, C, H, W), dtype=jnp.float32)    # logits (f32)
    # Binary masks shipped as bf16 (exact for 0/1) to cut target HBM bytes.
    target = (jax.random.uniform(k2, (N, C, H, W)) > 0.5).astype(jnp.bfloat16)

    loss = edice_loss(inputs, target)
    jax.block_until_ready(loss)

    ref = edice_loss_ref(inputs, target)
    assert jnp.allclose(loss, ref, rtol=1e-4, atol=1e-5), (loss, ref)

    print("KERNEL_OK")
</pallas_src>

<mosaic_0001>
module attributes {stable_mosaic.version = 11 : i64} {
  func.func @_edice_partial_kernel(%arg0: i32, %arg1: i32, %arg2: i32, %arg3: memref<1x1x2x128xf32, #tpu.memory_space<vmem>>, %arg4: memref<1x1x2x128xbf16, #tpu.memory_space<vmem>>, %arg5: memref<1x1x1x8x128xf32, #tpu.memory_space<vmem>>) attributes {dimension_semantics = [#tpu.dimension_semantics<parallel>, #tpu.dimension_semantics<parallel>, #tpu.dimension_semantics<parallel>], iteration_bounds = array<i64: 3, 2, 1>, scalar_prefetch = 0 : i64, scratch_operands = 0 : i64, tpu.core_type = #tpu.core_type<tc>, window_params = [{transform_indices = @transform_0, window_bounds = array<i64: 1, 1, 2, 128>}, {transform_indices = @transform_1, window_bounds = array<i64: 1, 1, 2, 128>}, {transform_indices = @transform_2, window_bounds = array<i64: 1, 1, 1, 8, 128>}]} {
    %c0 = arith.constant 0 : index
    %c0_0 = arith.constant 0 : index
    %c0_1 = arith.constant 0 : index
    %c0_2 = arith.constant 0 : index
    %0 = vector.load %arg3[%c0, %c0_0, %c0_1, %c0_2] : memref<1x1x2x128xf32, #tpu.memory_space<vmem>>, vector<1x1x2x128xf32>
    %1 = vector.shape_cast %0 : vector<1x1x2x128xf32> to vector<2x128xf32>
    %c0_3 = arith.constant 0 : index
    %c0_4 = arith.constant 0 : index
    %c0_5 = arith.constant 0 : index
    %c0_6 = arith.constant 0 : index
    %2 = vector.load %arg4[%c0_3, %c0_4, %c0_5, %c0_6] : memref<1x1x2x128xbf16, #tpu.memory_space<vmem>>, vector<1x1x2x128xbf16>
    %3 = vector.shape_cast %2 : vector<1x1x2x128xbf16> to vector<2x128xbf16>
    %4 = arith.extf %3 : vector<2x128xbf16> to vector<2x128xf32>
    %5 = arith.negf %1 : vector<2x128xf32>
    %6 = math.exp %5 : vector<2x128xf32>
    %cst = arith.constant 1.000000e+00 : f32
    %7 = vector.broadcast %cst : f32 to vector<2x128xf32>
    %8 = arith.addf %7, %6 : vector<2x128xf32>
    %9 = arith.divf %7, %8 : vector<2x128xf32>
    %10 = math.log %9 : vector<2x128xf32>
    %cst_7 = arith.constant -1.000000e+02 : f32
    %11 = vector.broadcast %cst_7 : f32 to vector<2x128xf32>
    %12 = arith.maximumf %10, %11 : vector<2x128xf32>
    %13 = arith.subf %10, %1 : vector<2x128xf32>
    %cst_8 = arith.constant -1.000000e+02 : f32
    %14 = vector.broadcast %cst_8 : f32 to vector<2x128xf32>
    %15 = arith.maximumf %13, %14 : vector<2x128xf32>
    %16 = arith.mulf %4, %12 : vector<2x128xf32>
    %cst_9 = arith.constant 1.000000e+00 : f32
    %17 = vector.broadcast %cst_9 : f32 to vector<2x128xf32>
    %18 = arith.subf %17, %4 : vector<2x128xf32>
    %19 = arith.mulf %18, %15 : vector<2x128xf32>
    %20 = arith.addf %16, %19 : vector<2x128xf32>
    %cst_10 = arith.constant 0.000000e+00 : f32
    %21 = vector.broadcast %cst_10 : f32 to vector<2x128xf32>
    %22 = arith.subf %21, %20 : vector<2x128xf32>
    %23 = arith.mulf %9, %9 : vector<2x128xf32>
    %24 = arith.mulf %9, %4 : vector<2x128xf32>
    %cst_11 = arith.constant dense<0.000000e+00> : vector<128xf32>
    %25 = vector.multi_reduction <add>, %24, %cst_11 [0] : vector<2x128xf32> to vector<128xf32>
    %cst_12 = arith.constant dense<0.000000e+00> : vector<128xf32>
    %26 = vector.multi_reduction <add>, %23, %cst_12 [0] : vector<2x128xf32> to vector<128xf32>
    %27 = arith.mulf %4, %4 : vector<2x128xf32>
    %cst_13 = arith.constant dense<0.000000e+00> : vector<128xf32>
    %28 = vector.multi_reduction <add>, %27, %cst_13 [0] : vector<2x128xf32> to vector<128xf32>
    %cst_14 = arith.constant dense<0.000000e+00> : vector<128xf32>
    %29 = vector.multi_reduction <add>, %22, %cst_14 [0] : vector<2x128xf32> to vector<128xf32>
    %30 = tpu.iota {dimensions = array<i32: 0>} : vector<8x128xi32>
    %c0_i32 = arith.constant 0 : i32
    %31 = vector.broadcast %c0_i32 : i32 to vector<8x128xi32>
    %32 = arith.cmpi eq, %30, %31 : vector<8x128xi32>
    %cst_15 = arith.constant 0.000000e+00 : f32
    %33 = vector.shape_cast %25 : vector<128xf32> to vector<1x128xf32>
    %34 = vector.broadcast %33 : vector<1x128xf32> to vector<8x128xf32>
    %35 = vector.broadcast %cst_15 : f32 to vector<8x128xf32>
    %36 = arith.select %32, %34, %35 : vector<8x128xi1>, vector<8x128xf32>
    %c1_i32 = arith.constant 1 : i32
    %37 = vector.broadcast %c1_i32 : i32 to vector<8x128xi32>
    %38 = arith.cmpi eq, %30, %37 : vector<8x128xi32>
    %cst_16 = arith.constant 0.000000e+00 : f32
    %39 = vector.shape_cast %26 : vector<128xf32> to vector<1x128xf32>
    %40 = vector.broadcast %39 : vector<1x128xf32> to vector<8x128xf32>
    %41 = vector.broadcast %cst_16 : f32 to vector<8x128xf32>
    %42 = arith.select %38, %40, %41 : vector<8x128xi1>, vector<8x128xf32>
    %43 = arith.addf %36, %42 : vector<8x128xf32>
    %c2_i32 = arith.constant 2 : i32
    %44 = vector.broadcast %c2_i32 : i32 to vector<8x128xi32>
    %45 = arith.cmpi eq, %30, %44 : vector<8x128xi32>
    %cst_17 = arith.constant 0.000000e+00 : f32
    %46 = vector.shape_cast %28 : vector<128xf32> to vector<1x128xf32>
    %47 = vector.broadcast %46 : vector<1x128xf32> to vector<8x128xf32>
    %48 = vector.broadcast %cst_17 : f32 to vector<8x128xf32>
    %49 = arith.select %45, %47, %48 : vector<8x128xi1>, vector<8x128xf32>
    %50 = arith.addf %43, %49 : vector<8x128xf32>
    %c3_i32 = arith.constant 3 : i32
    %51 = vector.broadcast %c3_i32 : i32 to vector<8x128xi32>
    %52 = arith.cmpi eq, %30, %51 : vector<8x128xi32>
    %cst_18 = arith.constant 0.000000e+00 : f32
    %53 = vector.shape_cast %29 : vector<128xf32> to vector<1x128xf32>
    %54 = vector.broadcast %53 : vector<1x128xf32> to vector<8x128xf32>
    %55 = vector.broadcast %cst_18 : f32 to vector<8x128xf32>
    %56 = arith.select %52, %54, %55 : vector<8x128xi1>, vector<8x128xf32>
    %57 = arith.addf %50, %56 : vector<8x128xf32>
    %58 = vector.shape_cast %57 : vector<8x128xf32> to vector<1x1x1x8x128xf32>
    %c0_19 = arith.constant 0 : index
    %c0_20 = arith.constant 0 : index
    %c0_21 = arith.constant 0 : index
    %c0_22 = arith.constant 0 : index
    %c0_23 = arith.constant 0 : index
    %59 = vector.load %arg5[%c0_19, %c0_20, %c0_21, %c0_22, %c0_23] : memref<1x1x1x8x128xf32, #tpu.memory_space<vmem>>, vector<1x1x1x8x128xf32>
    tpu.vector_store %arg5[%c0_19, %c0_20, %c0_21, %c0_22, %c0_23], %58 {strides = array<i32>} : memref<1x1x1x8x128xf32, #tpu.memory_space<vmem>>, vector<1x1x1x8x128xf32>,
    return
  }
  func.func @transform_0(%arg0: i32, %arg1: i32, %arg2: i32) -> (i32, i32, i32, i32) {
    %c0_i32 = arith.constant 0 : i32
    %c0_i32_0 = arith.constant 0 : i32
    return %arg1, %arg0, %arg2, %c0_i32 : i32, i32, i32, i32
  }
  func.func @transform_1(%arg0: i32, %arg1: i32, %arg2: i32) -> (i32, i32, i32, i32) {
    %c0_i32 = arith.constant 0 : i32
    %c0_i32_0 = arith.constant 0 : i32
    return %arg1, %arg0, %arg2, %c0_i32 : i32, i32, i32, i32
  }
  func.func @transform_2(%arg0: i32, %arg1: i32, %arg2: i32) -> (i32, i32, i32, i32, i32) {
    %c0_i32 = arith.constant 0 : i32
    %c0_i32_0 = arith.constant 0 : i32
    %c0_i32_1 = arith.constant 0 : i32
    return %arg0, %arg1, %arg2, %c0_i32, %c0_i32_0 : i32, i32, i32, i32, i32
  }
}

</mosaic_0001>

<bundles_post_ra>
// kernel: tpu_custom_call.1
= control target key start
LH: loop header
LB: loop body
LE: loop exit
PB: predicated region body
PF: predicated region fallthrough
CT: control target
= control target key end

     0   :  { %7 = vsyncpa [#allocation3], 0  ;;  %s957_s0 = inlined_call_operand.hbm [shape: f32[2,3,2,128], index: 0, kind: input, shape index: {}]   ;;  %s958_s1 = inlined_call_operand.hbm [shape: bf16[2,3,2,128], index: 1, kind: input, shape index: {}]   ;;  %s959_s2 = inlined_call_operand.hbm [shape: f32[3,2,1,8,128], index: 2, kind: output, shape index: {}]  }
   0x1   :  { %9 = vsyncpa [#allocation3 + $0x1], 0 }
   0x2   :  { %10 = vsyncpa [#allocation6], 0 }
   0x3   :  { %12 = vsyncpa [#allocation6 + $0x1], 0 }
   0x4   :  { %13 = vsyncpa [#allocation4], 0 }
   0x5   :  { %15 = vsyncpa [#allocation4 + $0x1], 0  ;;  %s714_s9 = smov 0   ;;  %s716_s10 = smov 0  }
   0x6   :  { %s718_s11 = smov 0   ;;  %s720_s12 = smov 0  }
   0x7   :  { %s722_s13 = smov 0   ;;  %s724_s14 = smov 0  }
   0x8   :  { %s726_s15 = smov 0   ;;  %s728_s16 = smov 0  }
   0x9 LB: > { %s425_s17 = sadd.s32 4294967295, %s694_s16   ;;  %s426_s18 = sadd.s32 4294967294, %s694_s16   ;;  %s694_s16 = sphi %s728_s16, %s21_s16   ;;  %s690_s15 = sphi %s726_s15, %s979_s15   ;;  %s686_s14 = sphi %s724_s14, %s978_s14   ;;  %s682_s13 = sphi %s722_s13, %s977_s13   ;;  %s678_s12 = sphi %s720_s12, %s976_s12   ;;  %s674_s11 = sphi %s718_s11, %s975_s11   ;;  %s670_s10 = sphi %s716_s10, %s974_s10   ;;  %s666_s9 = sphi %s714_s9, %s973_s9  }
   0xa   : > { %s36_s19 = sadd.s32 1, %s686_s14  ;;  %s40_s20 = sadd.s32 1, %s690_s15 }
   0xb   : > { %p38_p0 = scmp.ge.s32.totalorder %s36_s19, 2  ;;  %s51_s21 = sadd.s32 1, %s674_s11 }
   0xc   : > { %p58_p1 = scmp.ne.s32.totalorder %s674_s11, %s670_s10  ;;  %p59_p2 = scmp.eq.s32.totalorder %s694_s16, 0 }
   0xd   : > { %s981_s19 = smov (%p38_p0, %s36_s19), 0  ;;  %s983_s20 = smov (!%p38_p0, %s40_s20), %s690_s15 }
   0xe   : > { %s44_s22 = ssub.s32 %s686_s14, %s981_s19  ;;  %p767_p3 = por %p59_p2, %p58_p1 }
   0xf   : > { %p42_p4 = scmp.ge.s32.totalorder %s983_s20, 3  ;;  %p64_p5 = scmp.ne.s32.totalorder %s670_s10, %s666_s9 }
  0x10   : > { %p65_p6 = scmp.eq.s32.totalorder %s425_s17, 0  ;;  %p122_p7 = scmp.eq.s32.totalorder %s425_s17, 5 }
  0x11   : > { %s985_s20 = smov (%p42_p4, %s983_s20), 0  ;;  %p128_p10 = scmp.eq.s32.totalorder %s426_s18, 5 }
  0x12   : > { %p775_p8 = por %p65_p6, %p64_p5  ;;  %p779_p9 = por %p122_p7, %p58_p1 }
  0x13   : > { %s45_s26 = ssub.s32 %s690_s15, %s985_s20  ;;  %p785_p12 = por %p128_p10, %p64_p5 }
  0x14   : > { %s963_s24 = scalar_select %p775_p8, 1, 0 }
  0x15   : > { %s964_s25 = scalar_select %p779_p9, 1, 0 }
  0x16   : > { %s46_s27 = sor.u32 %s45_s26, %s44_s22  ;;  %p460_p13 = scmp.lt.s32.totalorder %s694_s16, 6 }
  0x17   : > { %p49_p11 = scmp.eq.s32.totalorder %s46_s27, 0  ;;  %s791_s29 = sand.u32 1, %s674_s11  }
  0x18   : > { %s965_s28 = scalar_select %p785_p12, 1, 0 }
  0x19   : > { %s794_s30 = scalar_select %p49_p11, %s674_s11, %s51_s21  }
  0x1a   : > { %s429_s3 = sshll.u32 %s791_s29, 1  ;;  %s441_s4 = smul.u32 3, %s686_s14 }
  0x1b   : > { %s152_s5 = scalar_lea.vmem [#allocation2], %s429_s3  ;;  %p800_p0 = pnand %p460_p13, %p767_p3 }
  0x1c   : > { %s162_s6 = sshll.u32 %s152_s5, 4  ;;  %s805_s8 = sadd.s32 %s690_s15, %s441_s4  ;;  %s807_s6 = int_to_ptr.vmem [resolvable:$true] %s162_s6 }
  0x1d   : > { %s430_s17 = sshll.u32 %s805_s8, 5  ;;  %s149_s23 = scalar_lea.sflag [#allocation3], %s791_s29 }
  0x1e   : > { %s813_s22 = scalar_lea.hbm %s957_s0, %s430_s17  ;;  %p534_p3 = pneg %p800_p0 }
  0x1f   : > { %s532_s26 = scalar_lea.hbm %s813_s22, 32  ;;  %s537_s4 = scalar_lea.hbm %s957_s0, 192 }
  0x20   : > { %p533_p2 = scmp.ne.s32.totalorder %s813_s22, %s532_s26  ;;  %p538_p6 = scmp.lt.u32.totalorder %s813_s22, %s957_s0 }
  0x21   : > { %p539_p7 = scmp.lt.u32.totalorder %s537_s4, %s532_s26  ;;  %p541_p11 = scmp.lt.u32.totalorder %s532_s26, %s813_s22 }
  0x22   : > { %p535_p4 = pnand %p534_p3, %p533_p2 }
  0x23   : > { %p540_p10 = por %p539_p7, %p538_p6 }
  0x24   : > { %p536_p5 = pneg %p535_p4 }
  0x25   : > { %p542_p13 = por %p541_p11, %p540_p10 }
  0x27   : > { %p543_p1 = pnand %p542_p13, %p536_p5 }
  0x29   : > { %546 = shalt.err (!%p543_p1)
}
  0x2a   : > { %s547_s18 = scalar_lea.vmem %s807_s6, 32  ;;  %s696_s21 = smov [#allocation2]  }
  0x2b   : > { %p548_p2 = scmp.ne.s32.totalorder %s807_s6, %s547_s18  ;;  %s552_s27 = sshll.u32 %s696_s21, 4  ;;  %s553_s27 = int_to_ptr.vmem [resolvable:$false] %s552_s27 }
  0x2c   : > { %s554_s3 = scalar_lea.vmem %s553_s27, 64  ;;  %p555_p9 = scmp.lt.s32.totalorder %s807_s6, %s553_s27 }
  0x2d   : > { %p550_p4 = pnand %p548_p2, %p534_p3  ;;  %p556_p6 = scmp.lt.s32.totalorder %s554_s3, %s547_s18 }
  0x2f   : > { %p551_p12 = pneg %p550_p4  ;;  %p557_p7 = por %p556_p6, %p555_p9 }
  0x31   : > { %p558_p10 = pnand %p557_p7, %p551_p12 }
  0x33   : > { %561 = shalt.err (!%p558_p10)
}
  0x34   : > { %452 = dma.hbm_to_vmem [thread:$0]  (!%p800_p0), %s813_s22, 32, %s807_s6, %s149_s23  }
  0x35   : > { %p187_p1 = scmp.lt.s32.totalorder %s694_s16, 7  ;;  %s431_s26 = sshll.u32 %s805_s8, 4 }
  0x36   : > { %p967_p5 = scmp.ge.s32.totalorder %s694_s16, 1  ;;  %s853_s18 = scalar_lea.hbm %s958_s1, %s431_s26 }
  0x37   : > { %s172_s21 = scalar_lea.vmem [#allocation5], %s791_s29  ;;  %s170_s6 = scalar_lea.sflag [#allocation6], %s791_s29 }
  0x38   : > { %p846_p11 = pnand %p967_p5, %p187_p1  ;;  %s182_s27 = sshll.u32 %s172_s21, 4  ;;  %s183_s27 = int_to_ptr.vmem [resolvable:$true] %s182_s27 }
  0x39   : > { %s562_s22 = scalar_lea.hbm %s853_s18, 16  ;;  %s567_s3 = scalar_lea.hbm %s958_s1, 96 }
  0x3a   : > { %s968_s4 = scalar_select %p846_p11, 1, 0 }
  0x3b   : > { %p563_p9 = scmp.ne.s32.totalorder %s853_s18, %s562_s22  ;;  %p568_p2 = scmp.lt.u32.totalorder %s853_s18, %s958_s1 }
  0x3c   : > { %p569_p4 = scmp.lt.u32.totalorder %s567_s3, %s562_s22  ;;  %p571_p7 = scmp.lt.u32.totalorder %s562_s22, %s853_s18 }
  0x3d   : > { %p565_p12 = pnand %p563_p9, %p534_p3 }
  0x3e   : > { %p570_p6 = por %p569_p4, %p568_p2 }
  0x3f   : > { %p566_p13 = pneg %p565_p12 }
  0x40   : > { %p572_p10 = por %p571_p7, %p570_p6 }
  0x42   : > { %p573_p1 = pnand %p572_p10, %p566_p13 }
  0x44   : > { %576 = shalt.err (!%p573_p1)
}
  0x45   : > { %s577_s29 = scalar_lea.vmem %s183_s27, 16  ;;  %s697_s17 = smov [#allocation5]  }
  0x46   : > { %p578_p5 = scmp.ne.s32.totalorder %s183_s27, %s577_s29  ;;  %s582_s21 = sshll.u32 %s697_s17, 4  ;;  %s583_s21 = int_to_ptr.vmem [resolvable:$false] %s582_s21 }
  0x47   : > { %s584_s8 = scalar_lea.vmem %s583_s21, 32  ;;  %p585_p8 = scmp.lt.s32.totalorder %s183_s27, %s583_s21 }
  0x48   : > { %p580_p9 = pnand %p578_p5, %p534_p3  ;;  %p586_p11 = scmp.lt.s32.totalorder %s584_s8, %s577_s29 }
  0x4a   : > { %p581_p12 = pneg %p580_p9  ;;  %p587_p2 = por %p586_p11, %p585_p8 }
  0x4c   : > { %p588_p4 = pnand %p587_p2, %p581_p12 }
  0x4e   : > { %591 = shalt.err (!%p588_p4)
}
  0x4f   : > { %455 = dma.hbm_to_vmem [thread:$0]  (!%p800_p0), %s853_s18, 16, %s183_s27, %s170_s6  }
  0x50   : > { %p969_p13 = scmp.ne.s32.totalorder %s968_s4, 0 }
  0x51   : > { %s879_s22 = sand.u32 (!%p969_p13), 1, %s670_s10   ;;  %p970_p3 = scmp.ne.s32.totalorder (!%p969_p13), %s963_s24, 0 }
  0x52   : > { %191 = sbr.rel (%p969_p13) target bundleno = 172 (0xac), region = 28  ;;  %s433_s23 = sshll.u32 (!%p969_p13), %s879_s22, 1 }
  0x53   : > { %s194_s3 = scalar_lea.sflag (!%p969_p13), [#allocation3], %s879_s22  ;;  %s197_s26 = scalar_lea.vmem (!%p969_p13), [#allocation2], %s433_s23 }
  0x59   : > { %653 = dma.done.wait (%p970_p3), %s194_s3, 32  }
  0x5a   : > { %655 = vsyncadd (%p970_p3), %s194_s3, 4294967264  ;;  %s203_s7 = scalar_lea.sflag [#allocation6], %s879_s22  ;;  %s205_s4 = scalar_lea.vmem [#allocation5], %s879_s22 }
  0x5b   : > { %657 = dma.done.wait (%p970_p3), %s203_s7, 16  }
  0x5c   : > { %659 = vsyncadd (%p970_p3), %s203_s7, 4294967280  ;;  %v230_v0 = vld [vmem:[%s197_s26] sm:$0x3]  ;;  %vm251_vm0 = vcmask 1041408   ;;  %v281_v31 = vlaneseq  ;;  %s434_s24 = sshll.u32 %s879_s22, 3  ;;  %s437_s18 = sshll.u32 %s682_s13, 1 }
  0x5d   : > { %v435_v1 = vmul.f32 -1.442695, %v230_v0  ;;  %v231_v4 = vld [vmem:[%s205_s4] sm:$0x1]  ;;  %s308_s27 = sadd.s32 %s678_s12, %s437_s18  ;;  %s229_s6 = scalar_lea.vmem [#allocation7], %s434_s24 }
  0x5e   : > { %v232_v5 = vunpack.c.l.bf16 %v231_v4  ;;  %v282_v37 = vshrl.u32 %v281_v31, 7  ;;  %s312_s5 = sshll.u32 %s229_s6, 4  ;;  %s438_s29 = sshll.u32 %s308_s27, 7  ;;  %s900_s5 = int_to_ptr.vmem [resolvable:$true] %s312_s5 }
  0x5f   : > { %526 = vpow2.f32 %v435_v1  ;;  %s905_s13 = scalar_lea.hbm %s959_s2, %s438_s29  ;;  %s296_s12 = scalar_lea.sflag [#allocation4], %s879_s22 }
  0x60   : > { %v266_v7 = vmul.f32 %v232_v5, %v232_v5  ;;  %v245_v25 = vsub.f32 1.0, %v232_v5  ;;  %vm283_vm1 = vcmp.eq.s32.totalorder %v282_v37, 0  ;;  %vm285_vm2 = vcmp.eq.s32.totalorder %v282_v37, 1  ;;  %s592_s8 = scalar_lea.vmem %s900_s5, 128  ;;  %p971_p0 = scmp.ne.s32.totalorder %s964_s25, 0 }
  0x61   : > { %vm288_vm3 = vcmp.eq.s32.totalorder %v282_v37, 2  ;;  %vm291_vm4 = vcmp.eq.s32.totalorder %v282_v37, 3  ;;  %p593_p8 = scmp.ne.s32.totalorder %s900_s5, %s592_s8  ;;  %s698_s23 = smov [#allocation7]  }
  0x62   : > { %v267_v14 = vsel %vm251_vm0, %v266_v7, 0.0  ;;  %s596_s3 = sshll.u32 %s698_s23, 4  ;;  %s597_s3 = int_to_ptr.vmem [resolvable:$false] %s596_s3 }
  0x63   : > { %v268_v17 = vrot.slane %v267_v14, 4  ;;  %p594_p11 = pnand %p593_p8, %p971_p0  ;;  %s598_s26 = scalar_lea.vmem %s597_s3, 256 }
  0x64   : > { %p599_p7 = scmp.lt.s32.totalorder %s900_s5, %s597_s3  ;;  %p600_p10 = scmp.lt.s32.totalorder %s598_s26, %s592_s8 }
  0x65   : > { %v269_v21 = vadd.f32 %v268_v17, %v267_v14  ;;  %p595_p6 = pneg %p594_p11 }
  0x66   : > { %p601_p1 = por %p600_p10, %p599_p7 }
  0x67   : > { %v270_v28 = vrot.slane %v269_v21, 2 }
  0x68   : > { %p602_p5 = pnand %p601_p1, %p595_p6 }
  0x69   : > { %v527_v2 = vpop.eup %526  ;;  %v271_v35 = vadd.f32 %v270_v28, %v269_v21 }
  0x6a   : > { %v236_v3 = vadd.f32 1.0, %v527_v2 }
  0x6b   : > { %v272_v41 = vrot.slane %v271_v35, 1 }
  0x6c   : > { %528 = vrcp.f32 %v236_v3 }
  0x6d   : > { %v273_v44 = vadd.f32 %v272_v41, %v271_v35 }
  0x6f   : > { %v289_v51 = vsel %vm288_vm3, %v273_v44, 0.0 }
  0x76   : > { %v529_v6 = vpop.eup %528 }
  0x77   : > { %530 = vlog2.f32 %v529_v6  ;;  %v249_v8 = vmul.f32 %v529_v6, %v529_v6  ;;  %v250_v9 = vmul.f32 %v529_v6, %v232_v5 }
  0x79   : > { %v252_v10 = vsel %vm251_vm0, %v250_v9, 0.0  ;;  %v259_v11 = vsel %vm251_vm0, %v249_v8, 0.0 }
  0x7a   : > { %v253_v12 = vrot.slane %v252_v10, 4  ;;  %v260_v13 = vrot.slane %v259_v11, 4 }
  0x7c   : > { %v254_v15 = vadd.f32 %v253_v12, %v252_v10  ;;  %v261_v16 = vadd.f32 %v260_v13, %v259_v11 }
  0x7e   : > { %v255_v19 = vrot.slane %v254_v15, 2  ;;  %v262_v20 = vrot.slane %v261_v16, 2 }
  0x80   : > { %v256_v26 = vadd.f32 %v255_v19, %v254_v15  ;;  %v263_v27 = vadd.f32 %v262_v20, %v261_v16 }
  0x81   : > { %v531_v18 = vpop.eup %530 }
  0x82   : > { %v240_v22 = vmul.f32 0.6931472, %v531_v18  ;;  %v257_v33 = vrot.slane %v256_v26, 1  ;;  %v264_v34 = vrot.slane %v263_v27, 1 }
  0x84   : > { %v241_v23 = vmax.f32 %v240_v22, -100.0  ;;  %v242_v24 = vsub.f32 %v240_v22, %v230_v0  ;;  %v258_v39 = vadd.f32 %v257_v33, %v256_v26  ;;  %v265_v40 = vadd.f32 %v264_v34, %v263_v27 }
  0x86   : > { %v243_v29 = vmax.f32 %v242_v24, -100.0  ;;  %v244_v30 = vmul.f32 %v241_v23, %v232_v5  ;;  %v284_v46 = vsel %vm283_vm1, %v258_v39, 0.0  ;;  %v286_v47 = vsel %vm285_vm2, %v265_v40, 0.0 }
  0x87   : > { %v287_v49 = vadd.f32 %v286_v47, %v284_v46 }
  0x88   : > { %v246_v32 = vmul.f32 %v245_v25, %v243_v29 }
  0x89   : > { %v290_v53 = vadd.f32 %v289_v51, %v287_v49 }
  0x8a   : > { %v247_v36 = vadd.f32 %v246_v32, %v244_v30 }
  0x8c   : > { %v248_v38 = vsub.f32 0.0, %v247_v36 }
  0x8e   : > { %v274_v42 = vsel %vm251_vm0, %v248_v38, 0.0 }
  0x8f   : > { %v275_v43 = vrot.slane %v274_v42, 4 }
  0x91   : > { %v276_v45 = vadd.f32 %v275_v43, %v274_v42 }
  0x93   : > { %v277_v48 = vrot.slane %v276_v45, 2 }
  0x95   : > { %v278_v50 = vadd.f32 %v277_v48, %v276_v45 }
  0x97   : > { %v279_v52 = vrot.slane %v278_v50, 1 }
  0x99   : > { %v280_v54 = vadd.f32 %v279_v52, %v278_v50 }
  0x9b   : > { %v292_v55 = vsel %vm291_vm4, %v280_v54, 0.0 }
  0x9c   : > { %v293_v56 = vadd.f32 %v292_v55, %v290_v53 }
  0x9e   : > { %294 = vst [vmem:[%s229_s6] sm:$0xff] %v293_v56 }
  0x9f   : > { %605 = shalt.err (!%p602_p5)
}
  0xa0   : > { %s606_s22 = scalar_lea.hbm %s905_s13, 128  ;;  %s610_s24 = scalar_lea.hbm %s959_s2, 768 }
  0xa1   : > { %p607_p9 = scmp.ne.s32.totalorder %s905_s13, %s606_s22  ;;  %p611_p4 = scmp.lt.u32.totalorder %s905_s13, %s959_s2 }
  0xa2   : > { %p612_p13 = scmp.lt.u32.totalorder %s610_s24, %s606_s22  ;;  %p614_p8 = scmp.lt.u32.totalorder %s606_s22, %s905_s13 }
  0xa3   : > { %p608_p12 = pnand %p607_p9, %p971_p0 }
  0xa4   : > { %p613_p3 = por %p612_p13, %p611_p4 }
  0xa5   : > { %p609_p2 = pneg %p608_p12 }
  0xa6   : > { %p615_p11 = por %p614_p8, %p613_p3 }
  0xa8   : > { %p616_p6 = pnand %p615_p11, %p609_p2 }
  0xaa   : > { %619 = shalt.err (!%p616_p6)
}
  0xab   : > { %447 = dma.vmem_to_hbm [thread:$0]  (%p971_p0), %s900_s5, 128, %s905_s13, %s296_s12  }
  0xac PF: > { %p461_p7 = scmp.ge.s32.totalorder %s694_s16, 2  ;;  %s324_s6 = sand.u32 1, %s666_s9  }
  0xad   : > { %p972_p10 = scmp.ne.s32.totalorder %s965_s28, 0  ;;  %s325_s29 = scalar_lea.sflag [#allocation4], %s324_s6 }
  0xaf   : > { %p457_p1 = pnand %p461_p7, %p972_p10 }
  0xb1   : > { %661 = dma.done.wait (!%p457_p1), %s325_s29, 128  }
  0xb2   : > { %663 = vsyncadd (!%p457_p1), %s325_s29, 4294967168  ;;  %s21_s16 = sadd.s32 1, %s694_s16   ;;  %s973_s9 = smov %s670_s10 }
  0xb3   : > { %p18_p5 = scmp.ge.s32.totalorder %s21_s16, 8   ;;  %s974_s10 = smov %s674_s11 }
  0xb4   : > { %s975_s11 = smov %s794_s30  ;;  %s976_s12 = smov %s686_s14 }
  0xb5   : > { %s977_s13 = smov %s690_s15  ;;  %s978_s14 = smov %s981_s19 }
  0xb6   : > { %s979_s15 = smov %s985_s20  ;;  %20 = sbr.rel (!%p18_p5) target bundleno = 9 (0x9), region = 86 }
  0xbd   :  { %330 = vsyncpa [#allocation3], 1 }
  0xbe   :  { %332 = vsyncpa [#allocation3 + $0x1], 1 }
  0xbf   :  { %333 = vsyncpa [#allocation6], 1 }
  0xc0   :  { %335 = vsyncpa [#allocation6 + $0x1], 1 }
  0xc1   :  { %336 = vsyncpa [#allocation4], 1 }
  0xc2   :  { %338 = vsyncpa [#allocation4 + $0x1], 1 }

</bundles_post_ra>
